<compile_context>
chip_gen: v7x
topology: tpu7x:2x2x1
jax: 0.10.0
libtpu: 0.0.40
codegen_flags: <defaults>
</compile_context>

<pallas_src>
import functools
import math

import jax
import jax.numpy as jnp
from jax.experimental import pallas as pl
from jax.experimental.pallas import tpu as pltpu


_NEG_TWO_OVER_E = -2.0 / math.e


# ----------------------------------------------------------------------------
# Lambert W, principal branch, z >= -1/e (float32).
# Branch-point series init + 4 Halley iterations (cubic convergence).
# Near the branch point the series itself is returned: there the Halley update
# is dominated by f32 rounding noise (f ~ ulp, denominator ~ (w+1) ~ 0) and
# would destroy the accurate series value.
# ----------------------------------------------------------------------------
def _lambertw_w0(z):
    z = z.astype(jnp.float32)
    e = jnp.float32(math.e)
    p = jnp.sqrt(jnp.maximum(2.0 * (e * z + 1.0), 0.0))
    w_series = -1.0 + p * (1.0 + p * (-1.0 / 3.0 + p * (11.0 / 72.0)))
    lz = jnp.log1p(jnp.maximum(z, 0.0))
    w = jnp.where(z < 0.0, w_series, lz * (1.0 - jnp.log1p(lz) / (lz + 2.0)))
    for _ in range(4):  # 4 Halley steps are plenty in f32 (review: 25 was overkill)
        ew = jnp.exp(w)
        f = w * ew - z
        wp1 = w + 1.0
        safe_wp1 = jnp.where(jnp.abs(wp1) < 1e-6, 1e-6, wp1)
        denom = ew * safe_wp1 - (w + 2.0) * f / (2.0 * safe_wp1)
        denom = jnp.where(jnp.abs(denom) < 1e-30, 1e-30, denom)
        w = w - f / denom
    return jnp.where(p < 0.05, w_series, w)


# Shared per-sample SuperLoss math (used by the kernel and the JAX reference).
def _super_loss_per_sample(ce, *, tau, lam, inv_lam):
    cl = ce - tau
    y = 0.5 * jnp.maximum(jnp.float32(_NEG_TWO_OVER_E), cl * inv_lam)
    w = _lambertw_w0(y)
    sigma = jnp.exp(-w)
    log_sigma = -w                       # == log(exp(-w)), saves an EUP log
    return cl * sigma + lam * log_sigma * log_sigma


# ----------------------------------------------------------------------------
# Pallas kernel: one batch tile per grid step, everything lane-dense.
#   x_ref   : (C, TILE_B)  logits, transposed, native dtype
#   t_ref   : (1, TILE_B)  int32 targets
#   ce_ref  : (1, TILE_B)  per-sample nll loss
#   nsum_ref: (1, TILE_B)  per-sample -sum_c log_softmax  (label-smoothing term)
#   sl_ref  : (1, TILE_B)  per-sample super loss
# ----------------------------------------------------------------------------
def _super_ce_kernel(x_ref, t_ref, ce_ref, nsum_ref, sl_ref, *, tau, lam, inv_lam):
    x = x_ref[...].astype(jnp.float32)               # cast in-kernel (bf16-friendly)
    t = t_ref[...]                                   # (1, TILE_B) int32
    n_classes, tile_b = x.shape

    # log_softmax over the class (sublane) axis.
    m = jnp.max(x, axis=0, keepdims=True)            # (1, TILE_B)
    s = jnp.sum(jnp.exp(x - m), axis=0, keepdims=True)
    lp = x - (m + jnp.log(s))                        # (C, TILE_B) log-probs

    # Label-smoothing term, per sample (lane-dense).
    nsum_ref[...] = -jnp.sum(lp, axis=0, keepdims=True)

    # nll_loss(log_preds, target, reduction='none'): class iota over sublanes,
    # target broadcast over lanes -> a single vreg-resident compare (VPU).
    cls_iota = jax.lax.broadcasted_iota(jnp.int32, (n_classes, tile_b), 0)
    onehot = (cls_iota == t).astype(jnp.float32)
    ce = -jnp.sum(lp * onehot, axis=0, keepdims=True)   # (1, TILE_B)
    ce_ref[...] = ce

    # SuperLoss per sample (lane-dense).
    sl_ref[...] = _super_loss_per_sample(ce, tau=tau, lam=lam, inv_lam=inv_lam)


def _round_up(x, m):
    return (x + m - 1) // m * m


def label_smoothing_ce_super_ce_loss(logits, target, *, classes=10, eps=0.01,
                                     lam=0.5, tile_b=1024):
    """Pallas-TPU forward of LabelSmoothingCrossEntropyWithSuperCELoss.

    Returns (loss_cls, exp(super_loss), score_list, celoss, tau), mirroring the
    PyTorch module (reduction='mean').
    """
    B, C = logits.shape
    tau = math.log(classes)

    # Pad the batch to a lane multiple and tile it.
    b_pad = _round_up(max(B, 1), 128)
    tile_b = min(tile_b, b_pad)
    b_pad = _round_up(b_pad, tile_b)
    num_tiles = b_pad // tile_b

    # Transposed layout: batch on the 128-lane minor axis; native dtype.
    xt = jnp.pad(jnp.transpose(logits), ((0, 0), (0, b_pad - B)))
    tgt = jnp.pad(target.astype(jnp.int32).reshape(1, B), ((0, 0), (0, b_pad - B)))

    kernel = functools.partial(_super_ce_kernel, tau=float(tau), lam=float(lam),
                               inv_lam=float(1.0 / lam))

    ce_row, nsum_row, sl_row = pl.pallas_call(
        kernel,
        grid=(num_tiles,),
        in_specs=[
            pl.BlockSpec((C, tile_b), lambda i: (0, i)),
            pl.BlockSpec((1, tile_b), lambda i: (0, i)),
        ],
        out_specs=(
            pl.BlockSpec((1, tile_b), lambda i: (0, i)),
            pl.BlockSpec((1, tile_b), lambda i: (0, i)),
            pl.BlockSpec((1, tile_b), lambda i: (0, i)),
        ),
        out_shape=(
            jax.ShapeDtypeStruct((1, b_pad), jnp.float32),
            jax.ShapeDtypeStruct((1, b_pad), jnp.float32),
            jax.ShapeDtypeStruct((1, b_pad), jnp.float32),
        ),
        compiler_params=pltpu.CompilerParams(
            dimension_semantics=("parallel",)),   # independent tiles -> megacore OK
    )(xt, tgt)

    # Tiny scalar epilogue (B elements) done in the wrapper.
    inv_b = 1.0 / B
    celoss = ce_row[0, :B]
    ls_loss = jnp.sum(nsum_row[0, :B]) * inv_b          # reduction='mean'
    super_loss = jnp.sum(sl_row[0, :B]) * inv_b
    loss_cls = ls_loss * (eps / C) + (1.0 - eps) * super_loss
    score_list = celoss - jnp.float32(tau)
    return loss_cls, jnp.exp(super_loss), score_list, celoss, jnp.float32(tau)


# ----------------------------------------------------------------------------
# Plain-JAX reference (natural [B, C] layout) for a sanity check.
# ----------------------------------------------------------------------------
def _reference(logits, target, *, classes=10, eps=0.01, lam=0.5):
    B, C = logits.shape
    x = logits.astype(jnp.float32)
    lp = jax.nn.log_softmax(x, axis=-1)
    ls_loss = jnp.mean(-jnp.sum(lp, axis=-1))
    idx = target.astype(jnp.int32).reshape(B, 1)
    ce = -jnp.take_along_axis(lp, idx, axis=-1)[:, 0]
    tau = jnp.float32(math.log(classes))
    sl = _super_loss_per_sample(ce, tau=float(math.log(classes)), lam=float(lam),
                                inv_lam=float(1.0 / lam))
    super_loss = jnp.mean(sl)
    loss_cls = ls_loss * (eps / C) + (1.0 - eps) * super_loss
    return loss_cls, jnp.exp(super_loss), ce - tau, ce, tau


if __name__ == "__main__":
    key = jax.random.PRNGKey(0)
    k1, k2 = jax.random.split(key)
    B, C = 200, 10                      # batch of logits over 10 classes
    logits = jax.random.normal(k1, (B, C), dtype=jnp.float32)
    target = jax.random.randint(k2, (B,), 0, C, dtype=jnp.int32)

    out = label_smoothing_ce_super_ce_loss(logits, target, tile_b=128)
    loss_cls, exp_sl, score_list, celoss, tau = jax.block_until_ready(out)

    r_loss, r_exp, r_score, r_ce, r_tau = _reference(logits, target)

    # Scalars: slightly looser tolerance — the clamp 0.5*(-2/e) sits exactly on
    # the Lambert-W branch point where W has infinite slope, so transcendental
    # ulp differences between Mosaic and XLA can be mildly amplified.
    assert jnp.allclose(loss_cls, r_loss, atol=5e-4, rtol=5e-4), (loss_cls, r_loss)
    assert jnp.allclose(exp_sl, r_exp, atol=5e-4, rtol=5e-4), (exp_sl, r_exp)
    assert jnp.allclose(celoss, r_ce, atol=2e-4, rtol=2e-4)
    assert jnp.allclose(score_list, r_score, atol=2e-4, rtol=2e-4)

    print("KERNEL_OK")
</pallas_src>

<mosaic_0001>
module attributes {stable_mosaic.version = 11 : i64} {
  func.func @_super_ce_kernel(%arg0: i32, %arg1: memref<10x128xf32, #tpu.memory_space<vmem>>, %arg2: memref<1x128xi32, #tpu.memory_space<vmem>>, %arg3: memref<1x128xf32, #tpu.memory_space<vmem>>, %arg4: memref<1x128xf32, #tpu.memory_space<vmem>>, %arg5: memref<1x128xf32, #tpu.memory_space<vmem>>) attributes {dimension_semantics = [#tpu.dimension_semantics<parallel>], iteration_bounds = array<i64: 2>, scalar_prefetch = 0 : i64, scratch_operands = 0 : i64, tpu.core_type = #tpu.core_type<tc>, window_params = [{transform_indices = @transform_0, window_bounds = array<i64: 10, 128>}, {transform_indices = @transform_1, window_bounds = array<i64: 1, 128>}, {transform_indices = @transform_2, window_bounds = array<i64: 1, 128>}, {transform_indices = @transform_3, window_bounds = array<i64: 1, 128>}, {transform_indices = @transform_4, window_bounds = array<i64: 1, 128>}]} {
    %c0 = arith.constant 0 : index
    %c0_0 = arith.constant 0 : index
    %0 = vector.load %arg1[%c0, %c0_0] : memref<10x128xf32, #tpu.memory_space<vmem>>, vector<10x128xf32>
    %c0_1 = arith.constant 0 : index
    %c0_2 = arith.constant 0 : index
    %1 = vector.load %arg2[%c0_1, %c0_2] : memref<1x128xi32, #tpu.memory_space<vmem>>, vector<1x128xi32>
    %cst = arith.constant dense<0xFF800000> : vector<128xf32>
    %2 = vector.multi_reduction <maximumf>, %0, %cst [0] : vector<10x128xf32> to vector<128xf32>
    %3 = vector.shape_cast %2 : vector<128xf32> to vector<1x128xf32>
    %4 = vector.broadcast %3 : vector<1x128xf32> to vector<10x128xf32>
    %5 = arith.subf %0, %4 : vector<10x128xf32>
    %6 = math.exp %5 : vector<10x128xf32>
    %cst_3 = arith.constant dense<0.000000e+00> : vector<128xf32>
    %7 = vector.multi_reduction <add>, %6, %cst_3 [0] : vector<10x128xf32> to vector<128xf32>
    %8 = vector.shape_cast %7 : vector<128xf32> to vector<1x128xf32>
    %9 = math.log %8 : vector<1x128xf32>
    %10 = arith.addf %3, %9 : vector<1x128xf32>
    %11 = vector.broadcast %10 : vector<1x128xf32> to vector<10x128xf32>
    %12 = arith.subf %0, %11 : vector<10x128xf32>
    %cst_4 = arith.constant dense<0.000000e+00> : vector<128xf32>
    %13 = vector.multi_reduction <add>, %12, %cst_4 [0] : vector<10x128xf32> to vector<128xf32>
    %14 = vector.shape_cast %13 : vector<128xf32> to vector<1x128xf32>
    %cst_5 = arith.constant 0.000000e+00 : f32
    %15 = vector.broadcast %cst_5 : f32 to vector<1x128xf32>
    %16 = arith.subf %15, %14 : vector<1x128xf32>
    %c0_6 = arith.constant 0 : index
    %c0_7 = arith.constant 0 : index
    %17 = vector.load %arg4[%c0_6, %c0_7] : memref<1x128xf32, #tpu.memory_space<vmem>>, vector<1x128xf32>
    tpu.vector_store %arg4[%c0_6, %c0_7], %16 {strides = array<i32>} : memref<1x128xf32, #tpu.memory_space<vmem>>, vector<1x128xf32>,
    %18 = tpu.iota {dimensions = array<i32: 0>} : vector<10x128xi32>
    %19 = vector.broadcast %1 : vector<1x128xi32> to vector<10x128xi32>
    %20 = arith.cmpi eq, %18, %19 : vector<10x128xi32>
    %21 = arith.extui %20 : vector<10x128xi1> to vector<10x128xi32>
    %22 = arith.sitofp %21 : vector<10x128xi32> to vector<10x128xf32>
    %23 = arith.mulf %12, %22 : vector<10x128xf32>
    %cst_8 = arith.constant dense<0.000000e+00> : vector<128xf32>
    %24 = vector.multi_reduction <add>, %23, %cst_8 [0] : vector<10x128xf32> to vector<128xf32>
    %25 = vector.shape_cast %24 : vector<128xf32> to vector<1x128xf32>
    %cst_9 = arith.constant 0.000000e+00 : f32
    %26 = vector.broadcast %cst_9 : f32 to vector<1x128xf32>
    %27 = arith.subf %26, %25 : vector<1x128xf32>
    %c0_10 = arith.constant 0 : index
    %c0_11 = arith.constant 0 : index
    %28 = vector.load %arg3[%c0_10, %c0_11] : memref<1x128xf32, #tpu.memory_space<vmem>>, vector<1x128xf32>
    tpu.vector_store %arg3[%c0_10, %c0_11], %27 {strides = array<i32>} : memref<1x128xf32, #tpu.memory_space<vmem>>, vector<1x128xf32>,
    %cst_12 = arith.constant 2.30258512 : f32
    %29 = vector.broadcast %cst_12 : f32 to vector<1x128xf32>
    %30 = arith.subf %27, %29 : vector<1x128xf32>
    %cst_13 = arith.constant 2.000000e+00 : f32
    %31 = vector.broadcast %cst_13 : f32 to vector<1x128xf32>
    %32 = arith.mulf %30, %31 : vector<1x128xf32>
    %cst_14 = arith.constant -0.735758901 : f32
    %33 = vector.broadcast %cst_14 : f32 to vector<1x128xf32>
    %34 = arith.maximumf %33, %32 : vector<1x128xf32>
    %cst_15 = arith.constant 5.000000e-01 : f32
    %35 = vector.broadcast %cst_15 : f32 to vector<1x128xf32>
    %36 = arith.mulf %35, %34 : vector<1x128xf32>
    %cst_16 = arith.constant 2.71828175 : f32
    %37 = vector.broadcast %cst_16 : f32 to vector<1x128xf32>
    %38 = arith.mulf %37, %36 : vector<1x128xf32>
    %cst_17 = arith.constant 1.000000e+00 : f32
    %39 = vector.broadcast %cst_17 : f32 to vector<1x128xf32>
    %40 = arith.addf %38, %39 : vector<1x128xf32>
    %cst_18 = arith.constant 2.000000e+00 : f32
    %41 = vector.broadcast %cst_18 : f32 to vector<1x128xf32>
    %42 = arith.mulf %41, %40 : vector<1x128xf32>
    %cst_19 = arith.constant 0.000000e+00 : f32
    %43 = vector.broadcast %cst_19 : f32 to vector<1x128xf32>
    %44 = arith.maximumf %42, %43 : vector<1x128xf32>
    %45 = math.sqrt %44 : vector<1x128xf32>
    %cst_20 = arith.constant 0.152777776 : f32
    %46 = vector.broadcast %cst_20 : f32 to vector<1x128xf32>
    %47 = arith.mulf %45, %46 : vector<1x128xf32>
    %cst_21 = arith.constant -0.333333343 : f32
    %48 = vector.broadcast %cst_21 : f32 to vector<1x128xf32>
    %49 = arith.addf %48, %47 : vector<1x128xf32>
    %50 = arith.mulf %45, %49 : vector<1x128xf32>
    %cst_22 = arith.constant 1.000000e+00 : f32
    %51 = vector.broadcast %cst_22 : f32 to vector<1x128xf32>
    %52 = arith.addf %51, %50 : vector<1x128xf32>
    %53 = arith.mulf %45, %52 : vector<1x128xf32>
    %cst_23 = arith.constant -1.000000e+00 : f32
    %54 = vector.broadcast %cst_23 : f32 to vector<1x128xf32>
    %55 = arith.addf %54, %53 : vector<1x128xf32>
    %cst_24 = arith.constant 0.000000e+00 : f32
    %56 = vector.broadcast %cst_24 : f32 to vector<1x128xf32>
    %57 = arith.maximumf %36, %56 : vector<1x128xf32>
    %58 = math.log1p %57 : vector<1x128xf32>
    %cst_25 = arith.constant 0.000000e+00 : f32
    %59 = vector.broadcast %cst_25 : f32 to vector<1x128xf32>
    %60 = arith.cmpf olt, %36, %59 : vector<1x128xf32>
    %61 = math.log1p %58 : vector<1x128xf32>
    %cst_26 = arith.constant 2.000000e+00 : f32
    %62 = vector.broadcast %cst_26 : f32 to vector<1x128xf32>
    %63 = arith.addf %58, %62 : vector<1x128xf32>
    %64 = arith.divf %61, %63 : vector<1x128xf32>
    %cst_27 = arith.constant 1.000000e+00 : f32
    %65 = vector.broadcast %cst_27 : f32 to vector<1x128xf32>
    %66 = arith.subf %65, %64 : vector<1x128xf32>
    %67 = arith.mulf %58, %66 : vector<1x128xf32>
    %68 = arith.select %60, %55, %67 : vector<1x128xi1>, vector<1x128xf32>
    %69 = math.exp %68 : vector<1x128xf32>
    %70 = arith.mulf %68, %69 : vector<1x128xf32>
    %71 = arith.subf %70, %36 : vector<1x128xf32>
    %cst_28 = arith.constant 1.000000e+00 : f32
    %72 = vector.broadcast %cst_28 : f32 to vector<1x128xf32>
    %73 = arith.addf %68, %72 : vector<1x128xf32>
    %74 = math.absf %73 : vector<1x128xf32>
    %cst_29 = arith.constant 9.99999997E-7 : f32
    %75 = vector.broadcast %cst_29 : f32 to vector<1x128xf32>
    %76 = arith.cmpf olt, %74, %75 : vector<1x128xf32>
    %cst_30 = arith.constant 9.99999997E-7 : f32
    %77 = vector.broadcast %cst_30 : f32 to vector<1x128xf32>
    %78 = arith.select %76, %77, %73 : vector<1x128xi1>, vector<1x128xf32>
    %79 = arith.mulf %69, %78 : vector<1x128xf32>
    %cst_31 = arith.constant 2.000000e+00 : f32
    %80 = vector.broadcast %cst_31 : f32 to vector<1x128xf32>
    %81 = arith.addf %68, %80 : vector<1x128xf32>
    %82 = arith.mulf %81, %71 : vector<1x128xf32>
    %cst_32 = arith.constant 2.000000e+00 : f32
    %83 = vector.broadcast %cst_32 : f32 to vector<1x128xf32>
    %84 = arith.mulf %83, %78 : vector<1x128xf32>
    %85 = arith.divf %82, %84 : vector<1x128xf32>
    %86 = arith.subf %79, %85 : vector<1x128xf32>
    %87 = math.absf %86 : vector<1x128xf32>
    %cst_33 = arith.constant 1.000000e-30 : f32
    %88 = vector.broadcast %cst_33 : f32 to vector<1x128xf32>
    %89 = arith.cmpf olt, %87, %88 : vector<1x128xf32>
    %cst_34 = arith.constant 1.000000e-30 : f32
    %90 = vector.broadcast %cst_34 : f32 to vector<1x128xf32>
    %91 = arith.select %89, %90, %86 : vector<1x128xi1>, vector<1x128xf32>
    %92 = arith.divf %71, %91 : vector<1x128xf32>
    %93 = arith.subf %68, %92 : vector<1x128xf32>
    %94 = math.exp %93 : vector<1x128xf32>
    %95 = arith.mulf %93, %94 : vector<1x128xf32>
    %96 = arith.subf %95, %36 : vector<1x128xf32>
    %cst_35 = arith.constant 1.000000e+00 : f32
    %97 = vector.broadcast %cst_35 : f32 to vector<1x128xf32>
    %98 = arith.addf %93, %97 : vector<1x128xf32>
    %99 = math.absf %98 : vector<1x128xf32>
    %cst_36 = arith.constant 9.99999997E-7 : f32
    %100 = vector.broadcast %cst_36 : f32 to vector<1x128xf32>
    %101 = arith.cmpf olt, %99, %100 : vector<1x128xf32>
    %cst_37 = arith.constant 9.99999997E-7 : f32
    %102 = vector.broadcast %cst_37 : f32 to vector<1x128xf32>
    %103 = arith.select %101, %102, %98 : vector<1x128xi1>, vector<1x128xf32>
    %104 = arith.mulf %94, %103 : vector<1x128xf32>
    %cst_38 = arith.constant 2.000000e+00 : f32
    %105 = vector.broadcast %cst_38 : f32 to vector<1x128xf32>
    %106 = arith.addf %93, %105 : vector<1x128xf32>
    %107 = arith.mulf %106, %96 : vector<1x128xf32>
    %cst_39 = arith.constant 2.000000e+00 : f32
    %108 = vector.broadcast %cst_39 : f32 to vector<1x128xf32>
    %109 = arith.mulf %108, %103 : vector<1x128xf32>
    %110 = arith.divf %107, %109 : vector<1x128xf32>
    %111 = arith.subf %104, %110 : vector<1x128xf32>
    %112 = math.absf %111 : vector<1x128xf32>
    %cst_40 = arith.constant 1.000000e-30 : f32
    %113 = vector.broadcast %cst_40 : f32 to vector<1x128xf32>
    %114 = arith.cmpf olt, %112, %113 : vector<1x128xf32>
    %cst_41 = arith.constant 1.000000e-30 : f32
    %115 = vector.broadcast %cst_41 : f32 to vector<1x128xf32>
    %116 = arith.select %114, %115, %111 : vector<1x128xi1>, vector<1x128xf32>
    %117 = arith.divf %96, %116 : vector<1x128xf32>
    %118 = arith.subf %93, %117 : vector<1x128xf32>
    %119 = math.exp %118 : vector<1x128xf32>
    %120 = arith.mulf %118, %119 : vector<1x128xf32>
    %121 = arith.subf %120, %36 : vector<1x128xf32>
    %cst_42 = arith.constant 1.000000e+00 : f32
    %122 = vector.broadcast %cst_42 : f32 to vector<1x128xf32>
    %123 = arith.addf %118, %122 : vector<1x128xf32>
    %124 = math.absf %123 : vector<1x128xf32>
    %cst_43 = arith.constant 9.99999997E-7 : f32
    %125 = vector.broadcast %cst_43 : f32 to vector<1x128xf32>
    %126 = arith.cmpf olt, %124, %125 : vector<1x128xf32>
    %cst_44 = arith.constant 9.99999997E-7 : f32
    %127 = vector.broadcast %cst_44 : f32 to vector<1x128xf32>
    %128 = arith.select %126, %127, %123 : vector<1x128xi1>, vector<1x128xf32>
    %129 = arith.mulf %119, %128 : vector<1x128xf32>
    %cst_45 = arith.constant 2.000000e+00 : f32
    %130 = vector.broadcast %cst_45 : f32 to vector<1x128xf32>
    %131 = arith.addf %118, %130 : vector<1x128xf32>
    %132 = arith.mulf %131, %121 : vector<1x128xf32>
    %cst_46 = arith.constant 2.000000e+00 : f32
    %133 = vector.broadcast %cst_46 : f32 to vector<1x128xf32>
    %134 = arith.mulf %133, %128 : vector<1x128xf32>
    %135 = arith.divf %132, %134 : vector<1x128xf32>
    %136 = arith.subf %129, %135 : vector<1x128xf32>
    %137 = math.absf %136 : vector<1x128xf32>
    %cst_47 = arith.constant 1.000000e-30 : f32
    %138 = vector.broadcast %cst_47 : f32 to vector<1x128xf32>
    %139 = arith.cmpf olt, %137, %138 : vector<1x128xf32>
    %cst_48 = arith.constant 1.000000e-30 : f32
    %140 = vector.broadcast %cst_48 : f32 to vector<1x128xf32>
    %141 = arith.select %139, %140, %136 : vector<1x128xi1>, vector<1x128xf32>
    %142 = arith.divf %121, %141 : vector<1x128xf32>
    %143 = arith.subf %118, %142 : vector<1x128xf32>
    %144 = math.exp %143 : vector<1x128xf32>
    %145 = arith.mulf %143, %144 : vector<1x128xf32>
    %146 = arith.subf %145, %36 : vector<1x128xf32>
    %cst_49 = arith.constant 1.000000e+00 : f32
    %147 = vector.broadcast %cst_49 : f32 to vector<1x128xf32>
    %148 = arith.addf %143, %147 : vector<1x128xf32>
    %149 = math.absf %148 : vector<1x128xf32>
    %cst_50 = arith.constant 9.99999997E-7 : f32
    %150 = vector.broadcast %cst_50 : f32 to vector<1x128xf32>
    %151 = arith.cmpf olt, %149, %150 : vector<1x128xf32>
    %cst_51 = arith.constant 9.99999997E-7 : f32
    %152 = vector.broadcast %cst_51 : f32 to vector<1x128xf32>
    %153 = arith.select %151, %152, %148 : vector<1x128xi1>, vector<1x128xf32>
    %154 = arith.mulf %144, %153 : vector<1x128xf32>
    %cst_52 = arith.constant 2.000000e+00 : f32
    %155 = vector.broadcast %cst_52 : f32 to vector<1x128xf32>
    %156 = arith.addf %143, %155 : vector<1x128xf32>
    %157 = arith.mulf %156, %146 : vector<1x128xf32>
    %cst_53 = arith.constant 2.000000e+00 : f32
    %158 = vector.broadcast %cst_53 : f32 to vector<1x128xf32>
    %159 = arith.mulf %158, %153 : vector<1x128xf32>
    %160 = arith.divf %157, %159 : vector<1x128xf32>
    %161 = arith.subf %154, %160 : vector<1x128xf32>
    %162 = math.absf %161 : vector<1x128xf32>
    %cst_54 = arith.constant 1.000000e-30 : f32
    %163 = vector.broadcast %cst_54 : f32 to vector<1x128xf32>
    %164 = arith.cmpf olt, %162, %163 : vector<1x128xf32>
    %cst_55 = arith.constant 1.000000e-30 : f32
    %165 = vector.broadcast %cst_55 : f32 to vector<1x128xf32>
    %166 = arith.select %164, %165, %161 : vector<1x128xi1>, vector<1x128xf32>
    %167 = arith.divf %146, %166 : vector<1x128xf32>
    %168 = arith.subf %143, %167 : vector<1x128xf32>
    %cst_56 = arith.constant 5.000000e-02 : f32
    %169 = vector.broadcast %cst_56 : f32 to vector<1x128xf32>
    %170 = arith.cmpf olt, %45, %169 : vector<1x128xf32>
    %171 = arith.select %170, %55, %168 : vector<1x128xi1>, vector<1x128xf32>
    %cst_57 = arith.constant 0.000000e+00 : f32
    %172 = vector.broadcast %cst_57 : f32 to vector<1x128xf32>
    %173 = arith.subf %172, %171 : vector<1x128xf32>
    %174 = math.exp %173 : vector<1x128xf32>
    %cst_58 = arith.constant 0.000000e+00 : f32
    %175 = vector.broadcast %cst_58 : f32 to vector<1x128xf32>
    %176 = arith.subf %175, %171 : vector<1x128xf32>
    %177 = arith.mulf %30, %174 : vector<1x128xf32>
    %cst_59 = arith.constant 5.000000e-01 : f32
    %178 = vector.broadcast %cst_59 : f32 to vector<1x128xf32>
    %179 = arith.mulf %178, %176 : vector<1x128xf32>
    %180 = arith.mulf %179, %176 : vector<1x128xf32>
    %181 = arith.addf %177, %180 : vector<1x128xf32>
    %c0_60 = arith.constant 0 : index
    %c0_61 = arith.constant 0 : index
    %182 = vector.load %arg5[%c0_60, %c0_61] : memref<1x128xf32, #tpu.memory_space<vmem>>, vector<1x128xf32>
    tpu.vector_store %arg5[%c0_60, %c0_61], %181 {strides = array<i32>} : memref<1x128xf32, #tpu.memory_space<vmem>>, vector<1x128xf32>,
    return
  }
  func.func @transform_0(%arg0: i32) -> (i32, i32) {
    %c0_i32 = arith.constant 0 : i32
    %c0_i32_0 = arith.constant 0 : i32
    return %c0_i32, %arg0 : i32, i32
  }
  func.func @transform_1(%arg0: i32) -> (i32, i32) {
    %c0_i32 = arith.constant 0 : i32
    %c0_i32_0 = arith.constant 0 : i32
    return %c0_i32, %arg0 : i32, i32
  }
  func.func @transform_2(%arg0: i32) -> (i32, i32) {
    %c0_i32 = arith.constant 0 : i32
    %c0_i32_0 = arith.constant 0 : i32
    return %c0_i32, %arg0 : i32, i32
  }
  func.func @transform_3(%arg0: i32) -> (i32, i32) {
    %c0_i32 = arith.constant 0 : i32
    %c0_i32_0 = arith.constant 0 : i32
    return %c0_i32, %arg0 : i32, i32
  }
  func.func @transform_4(%arg0: i32) -> (i32, i32) {
    %c0_i32 = arith.constant 0 : i32
    %c0_i32_0 = arith.constant 0 : i32
    return %c0_i32, %arg0 : i32, i32
  }
}

</mosaic_0001>

<bundles_post_ra>
// kernel: tpu_custom_call.1
= control target key start
LH: loop header
LB: loop body
LE: loop exit
PB: predicated region body
PF: predicated region fallthrough
CT: control target
= control target key end

     0   :  { %10 = vsyncpa [#allocation3], 0  ;;  %s1212_s0 = inlined_call_operand.hbm [shape: f32[10,256], index: 0, kind: input, shape index: {}]   ;;  %s1213_s1 = inlined_call_operand.vmem [shape: s32[1,256], index: 1, kind: input, shape index: {}]   ;;  %s1214_s2 = inlined_call_operand.hbm [shape: f32[1,256], index: 2, kind: output, shape index: {0}]   ;;  %s1215_s3 = inlined_call_operand.hbm [shape: f32[1,256], index: 3, kind: output, shape index: {1}]   ;;  %s1216_s4 = inlined_call_operand.hbm [shape: f32[1,256], index: 4, kind: output, shape index: {2}]  }
   0x1   :  { %12 = vsyncpa [#allocation3 + $0x1], 0 }
   0x2   :  { %13 = vsyncpa [#allocation4], 0 }
   0x3   :  { %15 = vsyncpa [#allocation4 + $0x1], 0 }
   0x4   :  { %16 = vsyncpa [#allocation7], 0 }
   0x5   :  { %18 = vsyncpa [#allocation7 + $0x1], 0  ;;  %s933_s15 = smov 0   ;;  %s935_s16 = smov 0  }
   0x6   :  { %s937_s17 = smov 0   ;;  %s939_s18 = smov 0  }
   0x7 LB: > { %s954_s19 = sadd.s32 4294967295, %s898_s18   ;;  %s626_s20 = sadd.s32 4294967294, %s898_s18   ;;  %s898_s18 = sphi %s939_s18, %s1230_s18   ;;  %s894_s17 = sphi %s937_s17, %s1229_s17   ;;  %s890_s16 = sphi %s935_s16, %s1228_s16   ;;  %s886_s15 = sphi %s933_s15, %s1227_s15  }
   0x8   : > { %s958_s21 = sadd.s32 1, %s898_s18   ;;  %s31_s22 = sadd.s32 1, %s894_s17 }
   0x9   : > { %s28_s23 = ssub.s32 %s898_s18, %s958_s21  ;;  %p38_p0 = scmp.ne.s32.totalorder %s894_s17, %s890_s16 }
   0xa   : > { %p29_p1 = scmp.eq.s32.totalorder %s28_s23, 0  ;;  %p39_p2 = scmp.eq.s32.totalorder %s898_s18, 0 }
   0xb   : > { %p44_p3 = scmp.ne.s32.totalorder %s890_s16, %s886_s15  ;;  %p45_p4 = scmp.eq.s32.totalorder %s954_s19, 0 }
   0xc   : > { %s970_s24 = scalar_select %p29_p1, %s894_s17, %s31_s22  }
   0xd   : > { %p972_p5 = por %p39_p2, %p38_p0  ;;  %p976_p6 = por %p45_p4, %p44_p3 }
   0xe   : > { %p94_p7 = scmp.eq.s32.totalorder %s954_s19, 1  ;;  %p100_p8 = scmp.eq.s32.totalorder %s626_s20, 1 }
   0xf   : > { %p664_p10 = scmp.lt.s32.totalorder %s898_s18, 2  ;;  %s172_s29 = sand.u32 1, %s894_s17  }
  0x10   : > { %p985_p11 = por %p94_p7, %p38_p0  ;;  %p989_p12 = por %p100_p8, %p44_p3 }
  0x11   : > { %s630_s30 = sshll.u32 %s898_s18, 7  ;;  %s629_s5 = sshll.u32 %s172_s29, 4 }
  0x12   : > { %s1220_s27 = scalar_select %p985_p11, 1, 0 }
  0x13   : > { %s1221_s28 = scalar_select %p989_p12, 1, 0 }
  0x14   : > { %s998_s8 = scalar_lea.hbm %s1212_s0, %s630_s30  ;;  %s176_s9 = scalar_lea.vmem [#allocation2], %s629_s5 }
  0x15   : > { %s182_s10 = sshll.u32 %s176_s9, 4  ;;  %p1002_p13 = pnand %p664_p10, %p972_p5  ;;  %s1006_s10 = int_to_ptr.vmem [resolvable:$true] %s182_s10 }
  0x16   : > { %s1009_s12 = scalar_lea.sflag [#allocation3], %s172_s29  ;;  %s742_s13 = scalar_lea.hbm %s998_s8, 256 }
  0x17   : > { %p743_p1 = scmp.ne.s32.totalorder %s998_s8, %s742_s13  ;;  %p744_p2 = pneg %p1002_p13 }
  0x18   : > { %s747_s23 = scalar_lea.hbm %s1212_s0, 512  ;;  %p748_p5 = scmp.lt.u32.totalorder %s998_s8, %s1212_s0 }
  0x19   : > { %p745_p3 = pnand %p744_p2, %p743_p1  ;;  %p749_p7 = scmp.lt.u32.totalorder %s747_s23, %s742_s13 }
  0x1a   : > { %p751_p10 = scmp.lt.u32.totalorder %s742_s13, %s998_s8 }
  0x1b   : > { %p746_p4 = pneg %p745_p3  ;;  %p750_p8 = por %p749_p7, %p748_p5 }
  0x1d   : > { %p752_p9 = por %p751_p10, %p750_p8 }
  0x1f   : > { %p753_p0 = pnand %p752_p9, %p746_p4 }
  0x21   : > { %756 = shalt.err (!%p753_p0)
}
  0x22   : > { %s757_s29 = scalar_lea.vmem %s1006_s10, 256  ;;  %s900_s5 = smov [#allocation2]  }
  0x23   : > { %p758_p1 = scmp.ne.s32.totalorder %s1006_s10, %s757_s29  ;;  %s762_s6 = sshll.u32 %s900_s5, 4  ;;  %s763_s6 = int_to_ptr.vmem [resolvable:$false] %s762_s6 }
  0x24   : > { %s764_s7 = scalar_lea.vmem %s763_s6, 512  ;;  %p765_p11 = scmp.lt.s32.totalorder %s1006_s10, %s763_s6 }
  0x25   : > { %p760_p3 = pnand %p758_p1, %p744_p2  ;;  %p766_p5 = scmp.lt.s32.totalorder %s764_s7, %s757_s29 }
  0x27   : > { %p761_p12 = pneg %p760_p3  ;;  %p767_p7 = por %p766_p5, %p765_p11 }
  0x29   : > { %p768_p8 = pnand %p767_p7, %p761_p12 }
  0x2b   : > { %771 = shalt.err (!%p768_p8)
}
  0x2c   : > { %s901_s9 = smov 256   ;;  %s902_s13 = smov 128  }
  0x2d   : > { %s903_s14 = smov 8   ;;  %p196_p9 = scmp.lt.s32.totalorder %s898_s18, 3 }
  0x2e   : > { %653 = dma.hbm_to_vmem [thread:$0]  (!%p1002_p13), %s998_s8, 256, %s1006_s10, %s1009_s12, %s901_s9, %s902_s13, %s903_s14  }
  0x2f   : > { %p1223_p0 = scmp.ge.s32.totalorder %s898_s18, 1 }
  0x31   : > { %p197_p2 = pnand %p1223_p0, %p196_p9 }
  0x32   : > { %s1041_s22 = sand.u32 (!%p197_p2), 1, %s890_s16  }
  0x33   : > { %200 = sbr.rel (%p197_p2) target bundleno = 425 (0x1a9), region = 28  ;;  %s632_s23 = sshll.u32 (!%p197_p2), %s1041_s22, 4 }
  0x34   : > { %s203_s25 = scalar_lea.sflag (!%p197_p2), [#allocation3], %s1041_s22  ;;  %s206_s30 = scalar_lea.vmem (!%p197_p2), [#allocation2], %s632_s23 }
  0x3a   : > { %873 = dma.done.wait (%p976_p6), %s203_s25, 256  }
  0x3b   : > { %875 = vsyncadd (%p976_p6), %s203_s25, 4294967040  ;;  %vm247_vm0 = vcmask 1041408   ;;  %v244_v0 = vld [vmem:[%s206_s30] sm:$0xff]  ;;  %v245_v1 = vld [vmem:[%s206_s30 + $0x8] sm:$0x3]  ;;  %p241_p6 = scmp.lt.s32.totalorder %s954_s19, 1  ;;  %v285_v24 = vlaneseq }
  0x3c   : > { %v248_v2 = vsel %vm247_vm0, %v245_v1, -inf  ;;  %v904_v31 = vmov 0.0   ;;  %s234_s12 = scalar_lea.vmem [#allocation6], %s1041_s22  ;;  %s228_s29 = scalar_lea.vmem [#allocation5], %s1041_s22 }
  0x3d   : > { %v249_v3 = vmax.f32 %v244_v0, %v248_v2  ;;  %s242_s26 = scalar_select %p241_p6, %s954_s19, 1  ;;  %v286_v25 = vshrl.u32 %v285_v24, 7 }
  0x3e   : > { %s485_s5 = sshll.u32 %s234_s12, 4  ;;  %s472_s6 = sshll.u32 %s228_s29, 4  ;;  %s1089_s5 = int_to_ptr.vmem [resolvable:$true] %s485_s5  ;;  %s1101_s6 = int_to_ptr.vmem [resolvable:$true] %s472_s6 }
  0x3f   : > { %v250_v4 = vrot.slane %v249_v3, 4  ;;  %s243_s11 = scalar_lea.vmem %s1213_s1, %s242_s26  ;;  %v287_v26 = vadd.s32 8, %v286_v25  ;;  %s455_s7 = sand.u32 1, %s954_s19  }
  0x40   : > { %v633_v27 = vld [vmem:[%s243_s11] ss:$0 sm:$0xff]  ;;  %s1098_s9 = sshll.u32 %s954_s19, 4  ;;  %s1109_s25 = scalar_lea.sflag [#allocation7], %s455_s7 }
  0x41   : > { %v251_v5 = vmax.f32 %v249_v3, %v250_v4  ;;  %vm292_vm1 = vcmp.eq.s32.totalorder %v286_v25, %v633_v27  ;;  %vm293_vm2 = vcmp.eq.s32.totalorder %v287_v26, %v633_v27  ;;  %s1107_s23 = scalar_lea.hbm %s1215_s3, %s1098_s9  ;;  %s772_s30 = scalar_lea.vmem %s1089_s5, 16 }
  0x42   : > { %v634_v32 = vsel %vm292_vm1, 1.0, %v904_v31  ;;  %v635_v33 = vsel %vm293_vm2, 1.0, %v904_v31  ;;  %p773_p11 = scmp.ne.s32.totalorder %s1089_s5, %s772_s30  ;;  %p1224_p12 = scmp.ne.s32.totalorder %s1220_s27, 0 }
  0x43   : > { %v252_v6 = vrot.slane %v251_v5, 2  ;;  %s905_s19 = smov [#allocation6]  }
  0x44   : > { %p774_p13 = pnand %p773_p11, %p1224_p12  ;;  %s776_s26 = sshll.u32 %s905_s19, 4  ;;  %s777_s26 = int_to_ptr.vmem [resolvable:$false] %s776_s26 }
  0x45   : > { %v253_v7 = vmax.f32 %v251_v5, %v252_v6  ;;  %s778_s8 = scalar_lea.vmem %s777_s26, 32  ;;  %p779_p10 = scmp.lt.s32.totalorder %s1089_s5, %s777_s26 }
  0x46   : > { %p775_p4 = pneg %p774_p13  ;;  %p780_p1 = scmp.lt.s32.totalorder %s778_s8, %s772_s30 }
  0x47   : > { %v254_v8 = vrot.slane %v253_v7, 1 }
  0x48   : > { %p781_p3 = por %p780_p1, %p779_p10 }
  0x49   : > { %v255_v9 = vmax.f32 %v253_v7, %v254_v8 }
  0x4a   : > { %p782_p5 = pnand %p781_p3, %p775_p4 }
  0x4b   : > { %v256_v10 = vsub.f32 %v244_v0, %v255_v9  ;;  %v257_v11 = vsub.f32 %v245_v1, %v255_v9 }
  0x4d   : > { %v258_v12 = vmul.f32 1.442695, %v256_v10  ;;  %v260_v13 = vmul.f32 1.442695, %v257_v11 }
  0x4f   : > { %702 = vpow2.f32 %v258_v12 }
  0x50   : > { %704 = vpow2.f32 %v260_v13 }
  0x59   : > { %v703_v14 = vpop.eup %702 }
  0x5a   : > { %v705_v15 = vpop.eup %704 }
  0x5b   : > { %v262_v16 = vsel %vm247_vm0, %v705_v15, 0.0 }
  0x5c   : > { %v263_v17 = vadd.f32 %v703_v14, %v262_v16 }
  0x5e   : > { %v264_v18 = vrot.slane %v263_v17, 4 }
  0x60   : > { %v265_v19 = vadd.f32 %v264_v18, %v263_v17 }
  0x62   : > { %v266_v20 = vrot.slane %v265_v19, 2 }
  0x64   : > { %v267_v21 = vadd.f32 %v266_v20, %v265_v19 }
  0x66   : > { %v268_v22 = vrot.slane %v267_v21, 1 }
  0x68   : > { %v269_v23 = vadd.f32 %v268_v22, %v267_v21 }
  0x6a   : > { %706 = vlog2.f32 %v269_v23 }
  0x74   : > { %v707_v28 = vpop.eup %706 }
  0x75   : > { %v271_v29 = vmul.f32 0.6931472, %v707_v28 }
  0x77   : > { %v272_v30 = vadd.f32 %v271_v29, %v255_v9 }
  0x79   : > { %v273_v34 = vsub.f32 %v244_v0, %v272_v30  ;;  %v274_v35 = vsub.f32 %v245_v1, %v272_v30 }
  0x7b   : > { %v275_v36 = vsel %vm247_vm0, %v274_v35, 0.0  ;;  %v298_v37 = vmul.f32 %v634_v32, %v273_v34  ;;  %v299_v38 = vmul.f32 %v635_v33, %v274_v35 }
  0x7c   : > { %v276_v39 = vadd.f32 %v275_v36, %v273_v34 }
  0x7d   : > { %v300_v40 = vsel %vm247_vm0, %v299_v38, 0.0 }
  0x7e   : > { %v277_v41 = vrot.slane %v276_v39, 4  ;;  %v301_v42 = vadd.f32 %v300_v40, %v298_v37 }
  0x80   : > { %v278_v43 = vadd.f32 %v277_v41, %v276_v39  ;;  %v302_v44 = vrot.slane %v301_v42, 4 }
  0x82   : > { %v279_v45 = vrot.slane %v278_v43, 2  ;;  %v303_v46 = vadd.f32 %v302_v44, %v301_v42 }
  0x84   : > { %v280_v47 = vadd.f32 %v279_v45, %v278_v43  ;;  %v304_v48 = vrot.slane %v303_v46, 2 }
  0x86   : > { %v281_v49 = vrot.slane %v280_v47, 1  ;;  %v305_v50 = vadd.f32 %v304_v48, %v303_v46 }
  0x88   : > { %v282_v51 = vadd.f32 %v281_v49, %v280_v47  ;;  %v306_v52 = vrot.slane %v305_v50, 1 }
  0x8a   : > { %v283_v53 = vsub.f32 0.0, %v282_v51  ;;  %v307_v54 = vadd.f32 %v306_v52, %v305_v50 }
  0x8c   : > { %284 = vst [vmem:[%s234_s12] sm:$0x1] %v283_v53  ;;  %v308_v55 = vsub.f32 0.0, %v307_v54 }
  0x8e   : > { %309 = vst [vmem:[%s228_s29] sm:$0x1] %v308_v55  ;;  %v1064_v56 = vadd.f32 -2.3025851, %v308_v55 }
  0x90   : > { %v311_v57 = vmul.f32 2.0, %v1064_v56 }
  0x92   : > { %v312_v58 = vmax.f32 %v311_v57, -0.7357589 }
  0x94   : > { %v1067_v59 = vmul.f32 0.5, %v312_v58 }
  0x96   : > { %v314_v60 = vmul.f32 2.7182817, %v1067_v59  ;;  %v331_v61 = vmax.f32 %v1067_v59, 0.0  ;;  %vm341_vm7 = vcmp.lt.f32.partialorder %v1067_v59, 0.0 }
  0x98   : > { %v315_v62 = vadd.f32 1.0, %v314_v60  ;;  %v332_v63 = vadd.f32 1.0, %v331_v61  ;;  %v335_v1 = vmul.f32 -0.5, %v331_v61  ;;  %v338_v4 = vand.u32 2147483647, %v331_v61 }
  0x9a   : > { %v316_v0 = vmul.f32 2.0, %v315_v62  ;;  %708 = vlog2.f32 %v332_v63  ;;  %v336_v3 = vadd.f32 1.0, %v335_v1  ;;  %vm339_vm3 = vcmp.lt.f32.partialorder %v338_v4, 0.0004427343 }
  0x9c   : > { %v317_v2 = vmax.f32 %v316_v0, 0.0  ;;  %v337_v5 = vmul.f32 %v336_v3, %v331_v61 }
  0x9e   : > { %710 = vrsqrt.f32 %v317_v2  ;;  %vm320_vm4 = vcmp.eq.f32.partialorder %v317_v2, inf  ;;  %v323_v10 = vand.u32 2147483648, %v317_v2  ;;  %vm322_vm5 = vcmp.eq.f32.partialorder %v317_v2, 0.0 }
  0xa4   : > { %v709_v6 = vpop.eup %708 }
  0xa5   : > { %v334_v7 = vmul.f32 0.6931472, %v709_v6 }
  0xa7   : > { %v340_v8 = vsel %vm339_vm3, %v337_v5, %v334_v7 }
  0xa8   : > { %v711_v9 = vpop.eup %710  ;;  %v342_v11 = vadd.f32 1.0, %v340_v8  ;;  %v351_v12 = vadd.f32 2.0, %v340_v8  ;;  %v345_v15 = vmul.f32 -0.5, %v340_v8  ;;  %v348_v20 = vand.u32 2147483647, %v340_v8 }
  0xa9   : > { %v319_v13 = vmul.f32 %v711_v9, %v317_v2 }
  0xaa   : > { %712 = vlog2.f32 %v342_v11  ;;  %v346_v19 = vadd.f32 1.0, %v345_v15  ;;  %vm349_vm6 = vcmp.lt.f32.partialorder %v348_v20, 0.0004427343 }
  0xab   : > { %v321_v14 = vsel %vm320_vm4, %v317_v2, %v319_v13  ;;  %714 = vrcp.f32 %v351_v12 }
  0xac   : > { %v1071_v16 = vsel %vm322_vm5, %v323_v10, %v321_v14  ;;  %v347_v23 = vmul.f32 %v346_v19, %v340_v8 }
  0xad   : > { %v325_v17 = vmul.f32 0.15277778, %v1071_v16 }
  0xaf   : > { %v326_v18 = vadd.f32 -0.33333334, %v325_v17 }
  0xb1   : > { %v327_v21 = vmul.f32 %v326_v18, %v1071_v16 }
  0xb3   : > { %v328_v22 = vadd.f32 1.0, %v327_v21 }
  0xb4   : > { %v713_v24 = vpop.eup %712 }
  0xb5   : > { %v715_v25 = vpop.eup %714  ;;  %v344_v26 = vmul.f32 0.6931472, %v713_v24  ;;  %v329_v27 = vmul.f32 %v328_v22, %v1071_v16 }
  0xb7   : > { %v350_v28 = vsel %vm349_vm6, %v347_v23, %v344_v26  ;;  %v1076_v30 = vadd.f32 -1.0, %v329_v27 }
  0xb8   : > { %v353_v29 = vmul.f32 %v715_v25, %v350_v28 }
  0xba   : > { %v354_v31 = vsub.f32 1.0, %v353_v29 }
  0xbc   : > { %v355_v32 = vmul.f32 %v354_v31, %v340_v8 }
  0xbe   : > { %v356_v33 = vsel %vm341_vm7, %v1076_v30, %v355_v32 }
  0xbf   : > { %v357_v34 = vmul.f32 1.442695, %v356_v33  ;;  %v361_v35 = vadd.f32 1.0, %v356_v33  ;;  %v366_v41 = vadd.f32 2.0, %v356_v33 }
  0xc1   : > { %716 = vpow2.f32 %v357_v34  ;;  %v362_v36 = vand.u32 2147483647, %v361_v35 }
  0xc3   : > { %vm363_vm8 = vcmp.lt.f32.partialorder %v362_v36, 1e-06 }
  0xc4   : > { %v364_v37 = vsel %vm363_vm8, 1e-06, %v361_v35 }
  0xc5   : > { %v368_v38 = vmul.f32 2.0, %v364_v37 }
  0xc7   : > { %718 = vrcp.f32 %v368_v38 }
  0xcb   : > { %v717_v39 = vpop.eup %716 }
  0xcc   : > { %v359_v40 = vmul.f32 %v717_v39, %v356_v33  ;;  %v365_v43 = vmul.f32 %v717_v39, %v364_v37 }
  0xce   : > { %v360_v42 = vsub.f32 %v359_v40, %v1067_v59 }
  0xd0   : > { %v367_v44 = vmul.f32 %v366_v41, %v360_v42 }
  0xd1   : > { %v719_v45 = vpop.eup %718 }
  0xd2   : > { %v370_v46 = vmul.f32 %v719_v45, %v367_v44 }
  0xd4   : > { %v371_v47 = vsub.f32 %v365_v43, %v370_v46 }
  0xd6   : > { %v372_v48 = vand.u32 2147483647, %v371_v47 }
  0xd8   : > { %vm373_vm9 = vcmp.lt.f32.partialorder %v372_v48, 1e-30 }
  0xd9   : > { %v374_v49 = vsel %vm373_vm9, 1e-30, %v371_v47 }
  0xda   : > { %720 = vrcp.f32 %v374_v49 }
  0xe4   : > { %v721_v50 = vpop.eup %720 }
  0xe5   : > { %v376_v51 = vmul.f32 %v721_v50, %v360_v42 }
  0xe7   : > { %v1081_v52 = vsub.f32 %v356_v33, %v376_v51 }
  0xe9   : > { %v378_v53 = vmul.f32 1.442695, %v1081_v52  ;;  %v382_v54 = vadd.f32 1.0, %v1081_v52  ;;  %v387_v62 = vadd.f32 2.0, %v1081_v52 }
  0xeb   : > { %722 = vpow2.f32 %v378_v53  ;;  %v383_v55 = vand.u32 2147483647, %v382_v54 }
  0xed   : > { %vm384_vm10 = vcmp.lt.f32.partialorder %v383_v55, 1e-06 }
  0xee   : > { %v385_v57 = vsel %vm384_vm10, 1e-06, %v382_v54 }
  0xef   : > { %v389_v58 = vmul.f32 2.0, %v385_v57 }
  0xf1   : > { %724 = vrcp.f32 %v389_v58 }
  0xf5   : > { %v723_v60 = vpop.eup %722 }
  0xf6   : > { %v380_v61 = vmul.f32 %v723_v60, %v1081_v52  ;;  %v386_v0 = vmul.f32 %v723_v60, %v385_v57 }
  0xf8   : > { %v1094_v63 = vsub.f32 %v380_v61, %v1067_v59 }
  0xfa   : > { %v388_v1 = vmul.f32 %v387_v62, %v1094_v63 }
  0xfb   : > { %v725_v2 = vpop.eup %724 }
  0xfc   : > { %v391_v3 = vmul.f32 %v725_v2, %v388_v1 }
  0xfd   : > { %785 = shalt.err (!%p782_p5)
}
  0xfe   : > { %s786_s10 = scalar_lea.hbm %s1107_s23, 16  ;;  %s790_s29 = scalar_lea.hbm %s1215_s3, 32 }
  0xff   : > { %p787_p7 = scmp.ne.s32.totalorder %s1107_s23, %s786_s10  ;;  %p791_p0 = scmp.lt.u32.totalorder %s1107_s23, %s1215_s3 }
 0x100   : > { %p792_p2 = scmp.lt.u32.totalorder %s790_s29, %s786_s10  ;;  %p794_p11 = scmp.lt.u32.totalorder %s786_s10, %s1107_s23 }
 0x101   : > { %p788_p8 = pnand %p787_p7, %p1224_p12 }
 0x102   : > { %p793_p6 = por %p792_p2, %p791_p0 }
 0x103   : > { %p789_p9 = pneg %p788_p8 }
 0x104   : > { %p795_p13 = por %p794_p11, %p793_p6 }
 0x106   : > { %p796_p4 = pnand %p795_p13, %p789_p9 }
 0x108   : > { %799 = shalt.err (!%p796_p4)
}
 0x109   : > { %645 = dma.vmem_to_hbm [thread:$0]  (%p1224_p12), %s1089_s5, 16, %s1107_s23, %s1109_s25   ;;  %v392_v4 = vsub.f32 %v386_v0, %v391_v3 }
 0x10a   : > { %s1137_s19 = scalar_lea.hbm %s1214_s2, %s1098_s9  ;;  %s452_s26 = scalar_lea.sflag [#allocation4], %s1041_s22 }
 0x10b   : > { %s800_s8 = scalar_lea.vmem %s1101_s6, 16  ;;  %s906_s10 = smov [#allocation5]  }
 0x10c   : > { %p801_p10 = scmp.ne.s32.totalorder %s1101_s6, %s800_s8  ;;  %s804_s11 = sshll.u32 %s906_s10, 4  ;;  %s805_s11 = int_to_ptr.vmem [resolvable:$false] %s804_s11 }
 0x10d   : > { %s806_s12 = scalar_lea.vmem %s805_s11, 32  ;;  %p807_p5 = scmp.lt.s32.totalorder %s1101_s6, %s805_s11 }
 0x10e   : > { %p802_p1 = pnand %p801_p10, %p1224_p12  ;;  %p808_p7 = scmp.lt.s32.totalorder %s806_s12, %s800_s8 }
 0x110   : > { %p803_p3 = pneg %p802_p1  ;;  %p809_p8 = por %p808_p7, %p807_p5 }
 0x112   : > { %p810_p9 = pnand %p809_p8, %p803_p3 }
 0x114   : > { %813 = shalt.err (!%p810_p9)
}
 0x115   : > { %s814_s5 = scalar_lea.hbm %s1137_s19, 16  ;;  %s818_s7 = scalar_lea.hbm %s1214_s2, 32 }
 0x116   : > { %p815_p0 = scmp.ne.s32.totalorder %s1137_s19, %s814_s5  ;;  %p819_p11 = scmp.lt.u32.totalorder %s1137_s19, %s1214_s2 }
 0x117   : > { %p820_p13 = scmp.lt.u32.totalorder %s818_s7, %s814_s5  ;;  %p822_p10 = scmp.lt.u32.totalorder %s814_s5, %s1137_s19 }
 0x118   : > { %p816_p2 = pnand %p815_p0, %p1224_p12 }
 0x119   : > { %p821_p4 = por %p820_p13, %p819_p11 }
 0x11a   : > { %p817_p6 = pneg %p816_p2 }
 0x11b   : > { %p823_p1 = por %p822_p10, %p821_p4 }
 0x11d   : > { %p824_p3 = pnand %p823_p1, %p817_p6 }
 0x11f   : > { %827 = shalt.err (!%p824_p3)
}
 0x120   : > { %644 = dma.vmem_to_hbm [thread:$0]  (%p1224_p12), %s1101_s6, 16, %s1137_s19, %s452_s26   ;;  %v393_v5 = vand.u32 2147483647, %v392_v4  ;;  %vm441_vm0 = vcmp.lt.f32.partialorder %v1071_v16, 0.05 }
 0x121   : > { %s240_s6 = scalar_lea.vmem [#allocation8], %s1041_s22  ;;  %s496_s8 = scalar_lea.hbm %s1216_s4, %s1098_s9 }
 0x122   : > { %vm394_vm11 = vcmp.lt.f32.partialorder %v393_v5, 1e-30  ;;  %s498_s30 = sshll.u32 %s240_s6, 4  ;;  %s907_s22 = smov [#allocation8]   ;;  %s1169_s30 = int_to_ptr.vmem [resolvable:$true] %s498_s30 }
 0x123   : > { %v395_v6 = vsel %vm394_vm11, 1e-30, %v392_v4  ;;  %s828_s10 = scalar_lea.vmem %s1169_s30, 16  ;;  %s832_s11 = sshll.u32 %s907_s22, 4  ;;  %s833_s11 = int_to_ptr.vmem [resolvable:$false] %s832_s11 }
 0x124   : > { %726 = vrcp.f32 %v395_v6  ;;  %p829_p5 = scmp.ne.s32.totalorder %s1169_s30, %s828_s10  ;;  %s834_s12 = scalar_lea.vmem %s833_s11, 32 }
 0x125   : > { %p835_p9 = scmp.lt.s32.totalorder %s1169_s30, %s833_s11  ;;  %p836_p0 = scmp.lt.s32.totalorder %s834_s12, %s828_s10 }
 0x126   : > { %p830_p7 = pnand %p829_p5, %p1224_p12 }
 0x127   : > { %p837_p2 = por %p836_p0, %p835_p9 }
 0x128   : > { %p831_p8 = pneg %p830_p7 }
 0x12a   : > { %p838_p6 = pnand %p837_p2, %p831_p8 }
 0x12e   : > { %v727_v7 = vpop.eup %726 }
 0x12f   : > { %v397_v8 = vmul.f32 %v727_v7, %v1094_v63 }
 0x131   : > { %v398_v9 = vsub.f32 %v1081_v52, %v397_v8 }
 0x133   : > { %v399_v10 = vmul.f32 1.442695, %v398_v9  ;;  %v403_v11 = vadd.f32 1.0, %v398_v9  ;;  %v408_v18 = vadd.f32 2.0, %v398_v9 }
 0x135   : > { %728 = vpow2.f32 %v399_v10  ;;  %v404_v12 = vand.u32 2147483647, %v403_v11 }
 0x137   : > { %vm405_vm12 = vcmp.lt.f32.partialorder %v404_v12, 1e-06 }
 0x138   : > { %v406_v13 = vsel %vm405_vm12, 1e-06, %v403_v11 }
 0x139   : > { %v410_v14 = vmul.f32 2.0, %v406_v13 }
 0x13b   : > { %730 = vrcp.f32 %v410_v14 }
 0x13f   : > { %v729_v15 = vpop.eup %728 }
 0x140   : > { %v401_v17 = vmul.f32 %v729_v15, %v398_v9  ;;  %v407_v20 = vmul.f32 %v729_v15, %v406_v13 }
 0x142   : > { %v402_v19 = vsub.f32 %v401_v17, %v1067_v59 }
 0x144   : > { %v409_v21 = vmul.f32 %v408_v18, %v402_v19 }
 0x145   : > { %v731_v22 = vpop.eup %730 }
 0x146   : > { %v412_v23 = vmul.f32 %v731_v22, %v409_v21 }
 0x148   : > { %v413_v24 = vsub.f32 %v407_v20, %v412_v23 }
 0x14a   : > { %v414_v25 = vand.u32 2147483647, %v413_v24 }
 0x14c   : > { %vm415_vm13 = vcmp.lt.f32.partialorder %v414_v25, 1e-30 }
 0x14d   : > { %v416_v26 = vsel %vm415_vm13, 1e-30, %v413_v24 }
 0x14e   : > { %732 = vrcp.f32 %v416_v26 }
 0x158   : > { %v733_v27 = vpop.eup %732 }
 0x159   : > { %v418_v28 = vmul.f32 %v733_v27, %v402_v19 }
 0x15b   : > { %v419_v29 = vsub.f32 %v398_v9, %v418_v28 }
 0x15d   : > { %v420_v31 = vmul.f32 1.442695, %v419_v29  ;;  %v424_v32 = vadd.f32 1.0, %v419_v29  ;;  %v429_v38 = vadd.f32 2.0, %v419_v29 }
 0x15f   : > { %734 = vpow2.f32 %v420_v31  ;;  %v425_v33 = vand.u32 2147483647, %v424_v32 }
 0x161   : > { %vm426_vm14 = vcmp.lt.f32.partialorder %v425_v33, 1e-06 }
 0x162   : > { %v427_v34 = vsel %vm426_vm14, 1e-06, %v424_v32 }
 0x163   : > { %v431_v35 = vmul.f32 2.0, %v427_v34 }
 0x165   : > { %736 = vrcp.f32 %v431_v35 }
 0x169   : > { %v735_v36 = vpop.eup %734 }
 0x16a   : > { %v422_v37 = vmul.f32 %v735_v36, %v419_v29  ;;  %v428_v40 = vmul.f32 %v735_v36, %v427_v34 }
 0x16c   : > { %v423_v39 = vsub.f32 %v422_v37, %v1067_v59 }
 0x16e   : > { %v430_v41 = vmul.f32 %v429_v38, %v423_v39 }
 0x16f   : > { %v737_v42 = vpop.eup %736 }
 0x170   : > { %v433_v43 = vmul.f32 %v737_v42, %v430_v41 }
 0x172   : > { %v434_v44 = vsub.f32 %v428_v40, %v433_v43 }
 0x174   : > { %v435_v45 = vand.u32 2147483647, %v434_v44 }
 0x176   : > { %vm436_vm15 = vcmp.lt.f32.partialorder %v435_v45, 1e-30 }
 0x177   : > { %v437_v46 = vsel %vm436_vm15, 1e-30, %v434_v44 }
 0x178   : > { %738 = vrcp.f32 %v437_v46 }
 0x182   : > { %v739_v47 = vpop.eup %738 }
 0x183   : > { %v439_v48 = vmul.f32 %v739_v47, %v423_v39 }
 0x185   : > { %v440_v49 = vsub.f32 %v419_v29, %v439_v48 }
 0x187   : > { %v442_v50 = vsel %vm441_vm0, %v1076_v30, %v440_v49 }
 0x188   : > { %v443_v59 = vsub.f32 0.0, %v442_v50 }
 0x18a   : > { %v444_v51 = vmul.f32 1.442695, %v443_v59  ;;  %v447_v52 = vmul.f32 0.5, %v443_v59 }
 0x18c   : > { %740 = vpow2.f32 %v444_v51  ;;  %v448_v53 = vmul.f32 %v447_v52, %v443_v59 }
 0x196   : > { %v741_v54 = vpop.eup %740 }
 0x197   : > { %v446_v55 = vmul.f32 %v741_v54, %v1064_v56 }
 0x199   : > { %v449_v57 = vadd.f32 %v448_v53, %v446_v55 }
 0x19b   : > { %450 = vst [vmem:[%s240_s6] sm:$0x1] %v449_v57 }
 0x19c   : > { %841 = shalt.err (!%p838_p6)
}
 0x19d   : > { %s842_s5 = scalar_lea.hbm %s496_s8, 16  ;;  %s846_s29 = scalar_lea.hbm %s1216_s4, 32 }
 0x19e   : > { %p843_p11 = scmp.ne.s32.totalorder %s496_s8, %s842_s5  ;;  %p847_p10 = scmp.lt.u32.totalorder %s496_s8, %s1216_s4 }
 0x19f   : > { %p848_p1 = scmp.lt.u32.totalorder %s846_s29, %s842_s5  ;;  %p850_p5 = scmp.lt.u32.totalorder %s842_s5, %s496_s8 }
 0x1a0   : > { %p844_p13 = pnand %p843_p11, %p1224_p12 }
 0x1a1   : > { %p849_p3 = por %p848_p1, %p847_p10 }
 0x1a2   : > { %p845_p4 = pneg %p844_p13 }
 0x1a3   : > { %p851_p7 = por %p850_p5, %p849_p3 }
 0x1a5   : > { %p852_p8 = pnand %p851_p7, %p845_p4 }
 0x1a7   : > { %855 = shalt.err (!%p852_p8)
}
 0x1a8   : > { %646 = dma.vmem_to_hbm [thread:$0]  (%p1224_p12), %s1169_s30, 16, %s496_s8, %s1109_s25  }
 0x1a9 PF: > { %s510_s14 = sand.u32 1, %s886_s15   ;;  %p1225_p9 = scmp.ne.s32.totalorder %s1221_s28, 0 }
 0x1aa   : > { %p1226_p0 = scmp.ge.s32.totalorder %s898_s18, 2  ;;  %s511_s6 = scalar_lea.sflag [#allocation4], %s510_s14 }
 0x1ac   : > { %p655_p2 = pnand %p1226_p0, %p1225_p9 }
 0x1ae   : > { %877 = dma.done.wait (!%p655_p2), %s511_s6, 16  }
 0x1af   : > { %879 = vsyncadd (!%p655_p2), %s511_s6, 4294967280  ;;  %s518_s19 = sand.u32 1, %s626_s20  }
 0x1b0   : > { %s519_s26 = scalar_lea.sflag [#allocation7], %s518_s19 }
 0x1b1   : > { %881 = dma.done.wait (!%p655_p2), %s519_s26, 32  }
 0x1b2   : > { %883 = vsyncadd (!%p655_p2), %s519_s26, 4294967264  ;;  %p21_p12 = scmp.ge.s32.totalorder %s958_s21, 4   ;;  %s1227_s15 = smov %s890_s16 }
 0x1b3   : > { %s1228_s16 = smov %s894_s17  ;;  %s1229_s17 = smov %s970_s24 }
 0x1b4   : > { %s1230_s18 = smov %s958_s21  ;;  %23 = sbr.rel (!%p21_p12) target bundleno = 7 (0x7), region = 108 }
 0x1bb   :  { %531 = vsyncpa [#allocation3], 1 }
 0x1bc   :  { %533 = vsyncpa [#allocation3 + $0x1], 1 }
 0x1bd   :  { %534 = vsyncpa [#allocation4], 1 }
 0x1be   :  { %536 = vsyncpa [#allocation4 + $0x1], 1 }
 0x1bf   :  { %537 = vsyncpa [#allocation7], 1 }
 0x1c0   :  { %539 = vsyncpa [#allocation7 + $0x1], 1 }

</bundles_post_ra>
